<compile_context>
chip_gen: v6e
topology: v6e:2x2x1
jax: 0.10.0
libtpu: 0.0.40
codegen_flags: <defaults>
</compile_context>

<pallas_src>
import functools

import jax
import jax.numpy as jnp
from jax.experimental import pallas as pl
from jax.experimental.pallas import tpu as pltpu


def _patch_embed_kernel(p_ref, w_ref, b_ref, o_ref):
    # p_ref: (tm, K)   w_ref: (K, Ep)   b_ref: (1, Ep)   o_ref: (tm, Ep)
    acc = jnp.dot(p_ref[...], w_ref[...], preferred_element_type=jnp.float32)
    acc = acc + b_ref[...]                      # bias broadcast over rows
    o_ref[...] = acc.astype(o_ref.dtype)


def patch_embed(x, weight, bias, patch_size, *, row_tile=512):
    """
    x:      (B, C, H, W)   NCHW (same as PyTorch)
    weight: (E, C, p, p)   conv weight (PyTorch layout)
    bias:   (E,)
    returns (B, num_patches, E)
    """
    B, C, H, W = x.shape
    E = weight.shape[0]
    p = patch_size
    assert H % p == 0 and W % p == 0
    gh, gw = H // p, W // p
    N = gh * gw
    K = C * p * p
    BN = B * N

    # Lane-dense output: pad E up to a multiple of 128 (unmasked stores);
    # padding is sliced off in the wrapper.  No-op for real ViT (E=768).
    Ep = ((E + 127) // 128) * 128

    # --- glue: extract non-overlapping patches, channel-major flatten ---
    # (B,C,gh,p,gw,p) -> (B,gh,gw,C,p,p) -> (B*N, K).  Fused into the kernel's
    # input DMA via allow_input_fusion (no HBM round-trip of the patchified copy).
    patches = x.reshape(B, C, gh, p, gw, p)
    patches = jnp.transpose(patches, (0, 2, 4, 1, 3, 5)).reshape(BN, K)

    # Conv weight (E,C,p,p) -> matmul weight (K, Ep); bias -> (1, Ep).
    # (Weight is tiny; for production, pre-transpose once outside the jit path.)
    w_mat = jnp.transpose(weight.reshape(E, K), (1, 0))
    b_mat = bias.reshape(1, E).astype(jnp.float32)
    if Ep != E:
        w_mat = jnp.pad(w_mat, ((0, 0), (0, Ep - E)))
        b_mat = jnp.pad(b_mat, ((0, 0), (0, Ep - E)))
    w_mat = w_mat.astype(x.dtype)

    # Row tile: multiple of 8 (sublane), capped by a conservative VMEM estimate
    # (double-buffered input/output tiles + weight) to stay inside default
    # scoped VMEM on all generations (incl. v7x's 64 MiB physical).
    itemsize = jnp.dtype(x.dtype).itemsize
    if BN <= 8:
        tm = BN
    else:
        tm = max(8, (min(row_tile, BN) // 8) * 8)

    def _vmem_bytes(t):
        return (2 * t * K * itemsize        # double-buffered patch tiles
                + 2 * t * Ep * itemsize     # double-buffered output tiles
                + 2 * K * Ep * itemsize     # weight buffers
                + 2 * Ep * 4)               # bias
    while tm > 8 and _vmem_bytes(tm) > 24 * 1024 * 1024:
        tm = max(8, (tm // 2 // 8) * 8)

    grid = (pl.cdiv(BN, tm),)

    out_flat = pl.pallas_call(
        _patch_embed_kernel,
        out_shape=jax.ShapeDtypeStruct((BN, Ep), x.dtype),
        grid_spec=pltpu.PrefetchScalarGridSpec(
            num_scalar_prefetch=0,
            grid=grid,
            in_specs=[
                pl.BlockSpec((tm, K), lambda i: (i, 0)),   # row tile of patches
                pl.BlockSpec((K, Ep), lambda i: (0, 0)),   # whole weight, resident
                pl.BlockSpec((1, Ep), lambda i: (0, 0)),   # bias
            ],
            out_specs=pl.BlockSpec((tm, Ep), lambda i: (i, 0)),
        ),
        compiler_params=pltpu.CompilerParams(
            dimension_semantics=("parallel",),
            allow_input_fusion=[True, False, False],
        ),
    )(patches, w_mat, b_mat)

    out = out_flat[:, :E] if Ep != E else out_flat
    return out.reshape(B, N, E)


if __name__ == "__main__":
    # Small, module-consistent shapes: img=16, patch=4, in_chans=4, embed_dim=32
    img_size, patch_size, in_chans, embed_dim, batch = 16, 4, 4, 32, 2

    key = jax.random.PRNGKey(0)
    kx, kw, kb = jax.random.split(key, 3)

    x = jax.random.normal(kx, (batch, in_chans, img_size, img_size), jnp.float32)
    # Deterministic synthetic params (shapes match nn.Conv2d(in_chans, embed_dim, p, p))
    fan_in = in_chans * patch_size * patch_size
    bound = 1.0 / (fan_in ** 0.5)
    weight = jax.random.uniform(
        kw, (embed_dim, in_chans, patch_size, patch_size), jnp.float32,
        minval=-bound, maxval=bound)
    bias = jax.random.uniform(kb, (embed_dim,), jnp.float32,
                              minval=-bound, maxval=bound)

    fwd = jax.jit(functools.partial(patch_embed, patch_size=patch_size))
    out = fwd(x, weight, bias)
    jax.block_until_ready(out)

    # Sanity check against a plain-JAX conv reference (matches module.forward).
    ref = jax.lax.conv_general_dilated(
        x, weight, window_strides=(patch_size, patch_size), padding="VALID",
        dimension_numbers=("NCHW", "OIHW", "NCHW"))
    ref = ref + bias[None, :, None, None]
    Br, Er, gh, gw = ref.shape
    ref = ref.reshape(Br, Er, gh * gw).transpose(0, 2, 1)

    assert out.shape == (batch, (img_size // patch_size) ** 2, embed_dim)
    assert jnp.allclose(out, ref, atol=1e-5, rtol=1e-5)

    print("KERNEL_OK")
</pallas_src>

<mosaic_0001>
module attributes {stable_mosaic.version = 11 : i64} {
  func.func @_patch_embed_kernel(%arg0: i32, %arg1: memref<32x64xf32, #tpu.memory_space<vmem>>, %arg2: memref<64x128xf32, #tpu.memory_space<vmem>>, %arg3: memref<1x128xf32, #tpu.memory_space<vmem>>, %arg4: memref<32x128xf32, #tpu.memory_space<vmem>>) attributes {dimension_semantics = [#tpu.dimension_semantics<parallel>], iteration_bounds = array<i64: 1>, scalar_prefetch = 0 : i64, scratch_operands = 0 : i64, tpu.core_type = #tpu.core_type<tc>, window_params = [{transform_indices = @transform_0, window_bounds = array<i64: 32, 64>}, {pipeline_mode = #tpu.pipeline_mode<synchronous>, transform_indices = @transform_1, window_bounds = array<i64: 64, 128>}, {pipeline_mode = #tpu.pipeline_mode<synchronous>, transform_indices = @transform_2, window_bounds = array<i64: 1, 128>}, {transform_indices = @transform_3, window_bounds = array<i64: 32, 128>}]} {
    %c0 = arith.constant 0 : index
    %c0_0 = arith.constant 0 : index
    %0 = vector.load %arg1[%c0, %c0_0] : memref<32x64xf32, #tpu.memory_space<vmem>>, vector<32x64xf32>
    %c0_1 = arith.constant 0 : index
    %c0_2 = arith.constant 0 : index
    %1 = vector.load %arg2[%c0_1, %c0_2] : memref<64x128xf32, #tpu.memory_space<vmem>>, vector<64x128xf32>
    %cst = arith.constant dense<0.000000e+00> : vector<32x128xf32>
    %2 = tpu.matmul %0, %1, %cst {dimension_numbers = #tpu.dot_dimension_numbers<[1], [0], [0], [1], [0, 0, 1, 1], [], []>} : vector<32x64xf32>, vector<64x128xf32>, vector<32x128xf32> -> vector<32x128xf32>
    %c0_3 = arith.constant 0 : index
    %c0_4 = arith.constant 0 : index
    %3 = vector.load %arg3[%c0_3, %c0_4] : memref<1x128xf32, #tpu.memory_space<vmem>>, vector<1x128xf32>
    %4 = vector.broadcast %3 : vector<1x128xf32> to vector<32x128xf32>
    %5 = arith.addf %2, %4 : vector<32x128xf32>
    %c0_5 = arith.constant 0 : index
    %c0_6 = arith.constant 0 : index
    %6 = vector.load %arg4[%c0_5, %c0_6] : memref<32x128xf32, #tpu.memory_space<vmem>>, vector<32x128xf32>
    tpu.vector_store %arg4[%c0_5, %c0_6], %5 {strides = array<i32>} : memref<32x128xf32, #tpu.memory_space<vmem>>, vector<32x128xf32>,
    return
  }
  func.func @transform_0(%arg0: i32) -> (i32, i32) {
    %c0_i32 = arith.constant 0 : i32
    %c0_i32_0 = arith.constant 0 : i32
    return %arg0, %c0_i32 : i32, i32
  }
  func.func @transform_1(%arg0: i32) -> (i32, i32) {
    %c0_i32 = arith.constant 0 : i32
    %c0_i32_0 = arith.constant 0 : i32
    %c0_i32_1 = arith.constant 0 : i32
    return %c0_i32, %c0_i32_0 : i32, i32
  }
  func.func @transform_2(%arg0: i32) -> (i32, i32) {
    %c0_i32 = arith.constant 0 : i32
    %c0_i32_0 = arith.constant 0 : i32
    %c0_i32_1 = arith.constant 0 : i32
    return %c0_i32, %c0_i32_0 : i32, i32
  }
  func.func @transform_3(%arg0: i32) -> (i32, i32) {
    %c0_i32 = arith.constant 0 : i32
    %c0_i32_0 = arith.constant 0 : i32
    return %arg0, %c0_i32 : i32, i32
  }
}

</mosaic_0001>

<bundles_post_ra>
// kernel: patch_embed.1
= control target key start
LH: loop header
LB: loop body
LE: loop exit
PB: predicated region body
PF: predicated region fallthrough
CT: control target
= control target key end

     0   :  { %s297_s0 = inlined_call_operand.vmem [shape: f32[32,64], index: 0, kind: input, shape index: {}]   ;;  %s298_s1 = inlined_call_operand.vmem [shape: f32[64,128], index: 1, kind: input, shape index: {}]   ;;  %s299_s2 = inlined_call_operand.vmem [shape: f32[1,128], index: 2, kind: input, shape index: {}]   ;;  %s300_s3 = inlined_call_operand.hbm [shape: f32[32,128], index: 3, kind: output, shape index: {}]  }
   0x1   :  { %v26_v0 = vld [vmem:[%s298_s1 + $0x38] sm:$0xff]  ;;  %v25_v1 = vld [vmem:[%s298_s1 + $0x30] sm:$0xff]  ;;  %v24_v2 = vld [vmem:[%s298_s1 + $0x28] sm:$0xff] }
   0x2   :  { %169 = vmatprep.subr.mxu0 %v26_v0  ;;  %191 = vmatprep.subr.mxu1 %v26_v0  ;;  %v23_v3 = vld [vmem:[%s298_s1 + $0x20] sm:$0xff] }
   0x3   :  { %170 = vmatpush3.msra.mxu0 %v26_v0  ;;  %199 = vmatpush3.msra.mxu1 %v26_v0 }
   0x4   :  { %171 = vmatprep.subr.mxu0 %v25_v1  ;;  %192 = vmatprep.subr.mxu1 %v25_v1 }
   0x5   :  { %172 = vmatpush3.msra.mxu0 %v25_v1  ;;  %200 = vmatpush3.msra.mxu1 %v25_v1 }
   0x6   :  { %8 = vsyncpa [#allocation3], 0  ;;  %173 = vmatprep.subr.mxu0 %v24_v2  ;;  %193 = vmatprep.subr.mxu1 %v24_v2  ;;  %v22_v4 = vld [vmem:[%s298_s1 + $0x18] sm:$0xff]  ;;  %v21_v5 = vld [vmem:[%s298_s1 + $0x10] sm:$0xff]  ;;  %vm34_vm0 = vcmask 523264   ;;  %s232_s10 = smov [#allocation2]  }
   0x7   :  { %174 = vmatpush3.msra.mxu0 %v24_v2  ;;  %201 = vmatpush3.msra.mxu1 %v24_v2  ;;  %v20_v6 = vld [vmem:[%s298_s1 + $0x8] sm:$0xff]  ;;  %v19_v7 = vld [vmem:[%s298_s1] sm:$0xff]  ;;  %v17_v9 = vld [vmem:[%s297_s0 + $0x10] sm:$0xff]  ;;  %s141_s11 = sshll.u32 %s232_s10, 4  ;;  %s142_s11 = int_to_ptr.vmem [resolvable:$true] %s141_s11 }
   0x8   :  { %175 = vmatprep.subr.mxu0 %v23_v3  ;;  %194 = vmatprep.subr.mxu1 %v23_v3  ;;  %v15_v8 = vld [vmem:[%s297_s0] sm:$0xff]  ;;  %v16_v10 = vld [vmem:[%s297_s0 + $0x8] sm:$0xff]  ;;  %v18_v11 = vld [vmem:[%s297_s0 + $0x18] sm:$0xff]  ;;  %s210_s0 = scalar_lea.vmem %s142_s11, 512  ;;  %p215_p1 = scmp.lt.s32.totalorder %s142_s11, %s142_s11 }
   0x9   :  { %176 = vmatpush3.msra.mxu0 %v23_v3  ;;  %202 = vmatpush3.msra.mxu1 %v23_v3  ;;  %v152_v12 = vld [vmem:[%s299_s2] ss:$0 sm:$0xff]  ;;  %p211_p0 = scmp.ne.s32.totalorder %s142_s11, %s210_s0  ;;  %p216_p2 = scmp.lt.s32.totalorder %s210_s0, %s210_s0 }
   0xa   :  { %177 = vmatprep.subr.mxu0 %v22_v4  ;;  %195 = vmatprep.subr.mxu1 %v22_v4 }
   0xb   :  { %178 = vmatpush3.msra.mxu0 %v22_v4  ;;  %203 = vmatpush3.msra.mxu1 %v22_v4  ;;  %p217_p3 = por %p216_p2, %p215_p1 }
   0xc   :  { %179 = vmatprep.subr.mxu0 %v21_v5  ;;  %196 = vmatprep.subr.mxu1 %v21_v5 }
   0xd   :  { %180 = vmatpush3.msra.mxu0 %v21_v5  ;;  %204 = vmatpush3.msra.mxu1 %v21_v5  ;;  %p218_p4 = pnand %p217_p3, %p211_p0 }
   0xe   :  { %181 = vmatprep.subr.mxu0 %v20_v6  ;;  %197 = vmatprep.subr.mxu1 %v20_v6 }
   0xf   :  { %182 = vmatpush3.msra.mxu0 %v20_v6  ;;  %205 = vmatpush3.msra.mxu1 %v20_v6 }
  0x10   :  { %183 = vmatprep.subr.mxu0 %v19_v7  ;;  %198 = vmatprep.subr.mxu1 %v19_v7 }
  0x11   :  { %184 = vmatpush3.msra.mxu0 %v19_v7  ;;  %206 = vmatpush3.msra.mxu1 %v19_v7 }
  0x12   :  { %185 = vmatprep.mubr.msk.f32.mxu0 %vm34_vm0, %v15_v8  ;;  %188 = vmatprep.mubr.msk.f32.mxu1 %vm34_vm0, %v17_v9 }
  0x13   :  { %186 = vmatmul.mubr.msk.f32.vlgmr.msra.gmra.mxu0 %vm34_vm0, %v16_v10  ;;  %189 = vmatmul.mubr.msk.f32.vlgmr.msra.gmra.mxu1 %vm34_vm0, %v18_v11 }
  0xd3   :  { %v187_v13 = vpop.f32.mrf.mxu0  ;;  %v190_v14 = vpop.f32.mrf.mxu1 }
  0xd4   :  { %v119_v15 = vadd.f32 %v187_v13, %v152_v12  ;;  %v129_v16 = vadd.f32 %v190_v14, %v152_v12 }
  0xd5   :  { %v113_v17 = vpop.f32.mrf.mxu0  ;;  %v123_v18 = vpop.f32.mrf.mxu1 }
  0xd6   :  { %133 = vst [vmem:[#allocation2 + $0x8] sm:$0xff] %v119_v15  ;;  %135 = vst [vmem:[#allocation2 + $0x18] sm:$0xff] %v129_v16  ;;  %v114_v19 = vadd.f32 %v152_v12, %v113_v17  ;;  %v124_v20 = vadd.f32 %v152_v12, %v123_v18 }
  0xd8   :  { %132 = vst [vmem:[#allocation2] sm:$0xff] %v114_v19  ;;  %134 = vst [vmem:[#allocation2 + $0x10] sm:$0xff] %v124_v20 }
  0xd9   :  { %221 = shalt.err (!%p218_p4)
}
  0xda   :  { %s233_s2 = smov 128   ;;  %s234_s12 = smov 8  }
  0xdb   :  { %147 = dma.vmem_to_hbm [thread:$0]  %s142_s11, 512, %s300_s3, [#allocation3], %s233_s2, %s233_s2, %s234_s12  }
  0xdc   :  { %230 = dma.done.wait [#allocation3], 512  }
  0xdd   :  { %231 = vsyncadd [#allocation3], 4294966784 }
  0xde   :  { %151 = vsyncpa [#allocation3], 1 }

</bundles_post_ra>
